<compile_context>
chip_gen: v5e
topology: v5e:2x2
jax: 0.10.0
libtpu: 0.0.40
codegen_flags: <defaults>
</compile_context>

<pallas_src>
import functools

import jax
import jax.numpy as jnp
from jax.experimental import pallas as pl
from jax.experimental.pallas import tpu as pltpu


def _accuracy_kernel(pred_ref, tgt_ref, out_ref, *, topk, thrs, tile_n, n_valid):
    """Per-batch-tile top-k correctness counts (one partial row per grid step)."""
    i = pl.program_id(0)

    p = pred_ref[...].astype(jnp.float32)      # (tn, C) — cast on-chip (bf16 ok in HBM)
    tgt = tgt_ref[...]                         # (tn, 1) int32
    tn, C = p.shape

    col = jax.lax.broadcasted_iota(jnp.int32, (tn, C), 1)
    row = jax.lax.broadcasted_iota(jnp.int32, (tn, 1), 0)
    row_valid = (i * tile_n + row) < n_valid   # mask ragged tail rows (garbage in VMEM)

    # Single-pass rank test.
    #   tgt_score : the score predicted for the target class.
    #   rank      : number of classes strictly better, plus ties at a smaller column
    #               index (preserves the leading-index tie-break of topk/argsort).
    # target in top-k  <=>  rank < k ; threshold test is on the target's own score.
    is_tgt = col == tgt                                                   # (tn, C)
    tgt_score = jnp.max(jnp.where(is_tgt, p, -jnp.inf), axis=1, keepdims=True)  # (tn,1)
    gt_cnt = jnp.sum((p > tgt_score).astype(jnp.int32), axis=1, keepdims=True)
    tie_lt = jnp.sum(((p == tgt_score) & (col < tgt)).astype(jnp.int32),
                     axis=1, keepdims=True)
    rank = gt_cnt + tie_lt                                                # (tn, 1)

    # Compile-time (1, kt) rows of k values and thresholds, built without concatenate.
    kt = len(topk) * len(thrs)
    j_iota = jax.lax.broadcasted_iota(jnp.int32, (1, kt), 1)
    k_row = jnp.zeros((1, kt), jnp.int32)
    t_row = jnp.zeros((1, kt), jnp.float32)
    j = 0
    for k in topk:
        for thr in thrs:
            k_row = jnp.where(j_iota == j, jnp.int32(k), k_row)
            t_row = jnp.where(j_iota == j, jnp.float32(thr), t_row)
            j += 1

    hit = (rank < k_row) & (tgt_score > t_row) & row_valid                # (tn, kt)
    out_ref[...] = jnp.sum(hit.astype(jnp.float32), axis=0, keepdims=True)  # (1, kt)


def accuracy_pallas(pred, target, topk=(1,), thrs=(0.0,), tile_n=None):
    """pred: (N, C) float, target: (N,) int. Returns (len(topk), len(thrs)) f32 accuracies."""
    pred = jnp.asarray(pred)
    if not jnp.issubdtype(pred.dtype, jnp.floating):
        pred = pred.astype(jnp.float32)
    target = jnp.asarray(target, jnp.int32)
    N, C = pred.shape
    kt = len(topk) * len(thrs)
    itemsize = jnp.dtype(pred.dtype).itemsize

    # Pick the batch tile: as large as fits ~24 MiB per pipeline buffer (2 buffers
    # = 48 MiB -> safe inside v7x's 64 MiB VMEM; larger tiles give no extra benefit
    # for a bandwidth-bound kernel), capped at 2048 rows and at the (8-rounded) batch.
    if tile_n is None:
        per_buf_budget = 24 * 1024 * 1024
        tile_n = per_buf_budget // max(1, C * itemsize)
        tile_n = min(2048, tile_n)
    tile_n = max(8, (int(tile_n) // 8) * 8)
    tile_n = min(tile_n, max(8, (N // 8) * 8))

    num_tiles = pl.cdiv(N, tile_n)
    tgt2d = target.reshape(N, 1)

    kernel = functools.partial(
        _accuracy_kernel, topk=tuple(topk), thrs=tuple(thrs),
        tile_n=tile_n, n_valid=N)

    # VMEM limit: 2 double-buffered pred tiles + target tiles + headroom, capped
    # under the v7x per-core 64 MiB budget.
    vmem_needed = 2 * tile_n * C * itemsize + 2 * tile_n * 4 + (2 << 20)
    vmem_limit = int(min(60 << 20, max(vmem_needed + (4 << 20), 32 << 20)))

    cost = pl.CostEstimate(
        flops=int(3 * N * C),
        transcendentals=0,
        bytes_accessed=int(N * C * itemsize + N * 4 + num_tiles * kt * 4),
    )

    partial_counts = pl.pallas_call(
        kernel,
        out_shape=jax.ShapeDtypeStruct((num_tiles, 1, kt), jnp.float32),
        grid=(num_tiles,),
        in_specs=[
            pl.BlockSpec((tile_n, C), lambda i: (i, 0)),
            pl.BlockSpec((tile_n, 1), lambda i: (i, 0)),
        ],
        # One partial-count row per grid step (leading dim squeezed in-kernel) so the
        # batch axis can be marked parallel and shard across TensorCores on v7x.
        out_specs=pl.BlockSpec((None, 1, kt), lambda i: (i, 0, 0)),
        compiler_params=pltpu.CompilerParams(
            dimension_semantics=("parallel",),
            vmem_limit_bytes=vmem_limit),
        cost_estimate=cost,
    )(pred, tgt2d)

    counts = jnp.sum(partial_counts, axis=(0, 1))          # (kt,)
    return (counts * (100.0 / N)).reshape(len(topk), len(thrs))


class Accuracy:
    """Pallas counterpart of the PyTorch Accuracy module (topk tuple -> list[float])."""

    def __init__(self, topk=(1,)):
        if isinstance(topk, int):
            topk = (topk,)
        self.topk = tuple(topk)

    def __call__(self, pred, target):
        acc = accuracy_pallas(pred, target, topk=self.topk, thrs=(0.0,))
        # thrs is a single value => each topk entry is a scalar (matches torch module)
        return [acc[i, 0] for i in range(len(self.topk))]


def _reference(pred, target, topk, thr=0.0):
    """Pure-JAX reference mirroring accuracy_torch semantics."""
    pred = jnp.asarray(pred, jnp.float32)
    target = jnp.asarray(target, jnp.int32)
    maxk = max(topk)
    N = pred.shape[0]
    scores, labels = jax.lax.top_k(pred, maxk)          # (N, maxk)
    correct = (labels == target[:, None]) & (scores > thr)
    out = []
    for k in topk:
        out.append(jnp.any(correct[:, :k], axis=1).sum() * 100.0 / N)
    return out


if __name__ == "__main__":
    key = jax.random.PRNGKey(0)
    k_pred, k_tgt, k_pred2, k_tgt2 = jax.random.split(key, 4)

    # Small, grid-divisible case.
    N, C = 16, 32
    pred = jax.random.normal(k_pred, (N, C), dtype=jnp.float32)
    target = jax.random.randint(k_tgt, (N,), 0, C, dtype=jnp.int32)

    mod1 = Accuracy()                 # default topk=(1,)
    res1 = mod1(pred, target)
    jax.block_until_ready(res1)

    mod2 = Accuracy(topk=(1, 3))      # multi-k path
    res2 = mod2(pred, target)
    jax.block_until_ready(res2)

    ref1 = _reference(pred, target, (1,))
    ref2 = _reference(pred, target, (1, 3))

    # Ragged batch (N not a multiple of the tile) to exercise the in-kernel tail mask.
    N3, C3 = 13, 24
    pred3 = jax.random.normal(k_pred2, (N3, C3), dtype=jnp.float32)
    target3 = jax.random.randint(k_tgt2, (N3,), 0, C3, dtype=jnp.int32)
    res3 = Accuracy(topk=(1, 2))(pred3, target3)
    jax.block_until_ready(res3)
    ref3 = _reference(pred3, target3, (1, 2))

    ok = True
    for got, want in zip(res1 + res2 + res3, ref1 + ref2 + ref3):
        ok &= bool(jnp.allclose(got, want, atol=1e-4))
    assert ok, (res1, res2, res3, ref1, ref2, ref3)

    print("KERNEL_OK")
</pallas_src>

<mosaic_0001>
module attributes {stable_mosaic.version = 11 : i64} {
  func.func @_accuracy_kernel(%arg0: i32, %arg1: memref<16x32xf32, #tpu.memory_space<vmem>>, %arg2: memref<16x1xi32, #tpu.memory_space<vmem>>, %arg3: memref<1x1x1xf32, #tpu.memory_space<vmem>>) attributes {dimension_semantics = [#tpu.dimension_semantics<parallel>], iteration_bounds = array<i64: 1>, scalar_prefetch = 0 : i64, scratch_operands = 0 : i64, tpu.core_type = #tpu.core_type<tc>, window_params = [{transform_indices = @transform_0, window_bounds = array<i64: 16, 32>}, {transform_indices = @transform_1, window_bounds = array<i64: 16, 1>}, {transform_indices = @transform_2, window_bounds = array<i64: 1, 1, 1>}]} {
    %c0 = arith.constant 0 : index
    %c0_0 = arith.constant 0 : index
    %0 = vector.load %arg1[%c0, %c0_0] : memref<16x32xf32, #tpu.memory_space<vmem>>, vector<16x32xf32>
    %c0_1 = arith.constant 0 : index
    %c0_2 = arith.constant 0 : index
    %1 = vector.load %arg2[%c0_1, %c0_2] : memref<16x1xi32, #tpu.memory_space<vmem>>, vector<16x1xi32>
    %2 = tpu.iota {dimensions = array<i32: 1>} : vector<16x32xi32>
    %3 = tpu.iota {dimensions = array<i32: 0>} : vector<16x1xi32>
    %c16_i32 = arith.constant 16 : i32
    %4 = arith.muli %arg0, %c16_i32 : i32
    %5 = vector.broadcast %4 : i32 to vector<16x1xi32>
    %6 = arith.addi %5, %3 : vector<16x1xi32>
    %c16_i32_3 = arith.constant 16 : i32
    %7 = vector.broadcast %c16_i32_3 : i32 to vector<16x1xi32>
    %8 = arith.cmpi slt, %6, %7 : vector<16x1xi32>
    %9 = vector.broadcast %1 : vector<16x1xi32> to vector<16x32xi32>
    %10 = arith.cmpi eq, %2, %9 : vector<16x32xi32>
    %cst = arith.constant 0xFF800000 : f32
    %11 = vector.broadcast %cst : f32 to vector<16x32xf32>
    %12 = arith.select %10, %0, %11 : vector<16x32xi1>, vector<16x32xf32>
    %cst_4 = arith.constant dense<0xFF800000> : vector<16xf32>
    %13 = vector.multi_reduction <maximumf>, %12, %cst_4 [1] : vector<16x32xf32> to vector<16xf32>
    %14 = vector.shape_cast %13 : vector<16xf32> to vector<16x1xf32>
    %15 = vector.broadcast %14 : vector<16x1xf32> to vector<16x32xf32>
    %16 = arith.cmpf ogt, %0, %15 : vector<16x32xf32>
    %17 = arith.extui %16 : vector<16x32xi1> to vector<16x32xi32>
    %cst_5 = arith.constant dense<0> : vector<16xi32>
    %18 = vector.multi_reduction <add>, %17, %cst_5 [1] : vector<16x32xi32> to vector<16xi32>
    %19 = vector.shape_cast %18 : vector<16xi32> to vector<16x1xi32>
    %20 = vector.broadcast %14 : vector<16x1xf32> to vector<16x32xf32>
    %21 = arith.cmpf oeq, %0, %20 : vector<16x32xf32>
    %22 = vector.broadcast %1 : vector<16x1xi32> to vector<16x32xi32>
    %23 = arith.cmpi slt, %2, %22 : vector<16x32xi32>
    %24 = arith.andi %21, %23 : vector<16x32xi1>
    %25 = arith.extui %24 : vector<16x32xi1> to vector<16x32xi32>
    %cst_6 = arith.constant dense<0> : vector<16xi32>
    %26 = vector.multi_reduction <add>, %25, %cst_6 [1] : vector<16x32xi32> to vector<16xi32>
    %27 = vector.shape_cast %26 : vector<16xi32> to vector<16x1xi32>
    %28 = arith.addi %19, %27 : vector<16x1xi32>
    %29 = tpu.iota {dimensions = array<i32: 1>} : vector<1x1xi32>
    %c0_i32 = arith.constant 0 : i32
    %30 = vector.broadcast %c0_i32 : i32 to vector<1x1xi32>
    %cst_7 = arith.constant 0.000000e+00 : f32
    %31 = vector.broadcast %cst_7 : f32 to vector<1x1xf32>
    %c0_i32_8 = arith.constant 0 : i32
    %32 = vector.broadcast %c0_i32_8 : i32 to vector<1x1xi32>
    %33 = arith.cmpi eq, %29, %32 : vector<1x1xi32>
    %c1_i32 = arith.constant 1 : i32
    %34 = vector.broadcast %c1_i32 : i32 to vector<1x1xi32>
    %35 = arith.select %33, %34, %30 : vector<1x1xi1>, vector<1x1xi32>
    %c0_i32_9 = arith.constant 0 : i32
    %36 = vector.broadcast %c0_i32_9 : i32 to vector<1x1xi32>
    %37 = arith.cmpi eq, %29, %36 : vector<1x1xi32>
    %cst_10 = arith.constant 0.000000e+00 : f32
    %38 = vector.broadcast %cst_10 : f32 to vector<1x1xf32>
    %39 = arith.select %37, %38, %31 : vector<1x1xi1>, vector<1x1xf32>
    %40 = vector.broadcast %35 : vector<1x1xi32> to vector<16x1xi32>
    %41 = arith.cmpi slt, %28, %40 : vector<16x1xi32>
    %42 = vector.broadcast %39 : vector<1x1xf32> to vector<16x1xf32>
    %43 = arith.cmpf ogt, %14, %42 : vector<16x1xf32>
    %44 = arith.andi %41, %43 : vector<16x1xi1>
    %45 = arith.andi %44, %8 : vector<16x1xi1>
    %46 = arith.extui %45 : vector<16x1xi1> to vector<16x1xi32>
    %47 = arith.sitofp %46 : vector<16x1xi32> to vector<16x1xf32>
    %cst_11 = arith.constant dense<0.000000e+00> : vector<1xf32>
    %48 = vector.multi_reduction <add>, %47, %cst_11 [0] : vector<16x1xf32> to vector<1xf32>
    %49 = vector.shape_cast %48 : vector<1xf32> to vector<1x1xf32>
    %c0_12 = arith.constant 0 : index
    %c0_13 = arith.constant 0 : index
    %c0_14 = arith.constant 0 : index
    %50 = vector.load %arg3[%c0_12, %c0_13, %c0_14] : memref<1x1x1xf32, #tpu.memory_space<vmem>>, vector<1x1x1xf32>
    %51 = vector.shape_cast %50 : vector<1x1x1xf32> to vector<1x1xf32>
    %52 = vector.shape_cast %49 : vector<1x1xf32> to vector<1x1x1xf32>
    tpu.vector_store %arg3[%c0_12, %c0_13, %c0_14], %52 {strides = array<i32>} : memref<1x1x1xf32, #tpu.memory_space<vmem>>, vector<1x1x1xf32>,
    return
  }
  func.func @transform_0(%arg0: i32) -> (i32, i32) {
    %c0_i32 = arith.constant 0 : i32
    %c0_i32_0 = arith.constant 0 : i32
    return %arg0, %c0_i32 : i32, i32
  }
  func.func @transform_1(%arg0: i32) -> (i32, i32) {
    %c0_i32 = arith.constant 0 : i32
    %c0_i32_0 = arith.constant 0 : i32
    return %arg0, %c0_i32 : i32, i32
  }
  func.func @transform_2(%arg0: i32) -> (i32, i32, i32) {
    %c0_i32 = arith.constant 0 : i32
    %c0_i32_0 = arith.constant 0 : i32
    %c0_i32_1 = arith.constant 0 : i32
    return %arg0, %c0_i32, %c0_i32_0 : i32, i32, i32
  }
}

</mosaic_0001>

<bundles_post_ra>
// kernel: tpu_custom_call.1
= control target key start
LH: loop header
LB: loop body
LE: loop exit
PB: predicated region body
PF: predicated region fallthrough
CT: control target
= control target key end

     0   :  { %s246_s0 = inlined_call_operand.vmem [shape: f32[16,32], index: 0, kind: input, shape index: {}]   ;;  %s247_s1 = inlined_call_operand.vmem [shape: s32[16,1], index: 1, kind: input, shape index: {}]   ;;  %s248_s2 = inlined_call_operand.hbm [shape: f32[1,1,1], index: 2, kind: output, shape index: {}]  }
   0x1   :  { %v14_v0 = vld [vmem:[%s247_s1] sm:$0xff] }
   0x2   :  { %7 = vsyncpa [#allocation3], 0  ;;  %v184_v1 = vmov 0   ;;  %v15_v2 = vld [vmem:[%s247_s1 + $0x8] sm:$0xff]  ;;  %v16_v3 = vlaneseq  ;;  %v12_v5 = vld [vmem:[%s246_s0] sm:$0xff]  ;;  %vm37_vm0 = vcmask 261120  }
   0x3   :  { %157 = vset.pattern.permute.xlu0 %v184_v1  ;;  %v13_v9 = vld [vmem:[%s246_s0 + $0x8] sm:$0xff]  ;;  %vm124_vm13 = vcmask 7168   ;;  %s186_s0 = smov [#allocation2]   ;;  %s143_s19 = sshll.u32 %s248_s2, 4  ;;  %s144_s19 = int_to_ptr.hbm [resolvable:$true] %s143_s19 }
   0x4   :  { %28 = vperm.xlu0 %157, %v14_v0   ;;  %v209_v4 = vand.u32 127, %v16_v3  ;;  %v185_v3 = vmov 0.0   ;;  %s141_s1 = sshll.u32 %s186_s0, 4  ;;  %s142_s1 = int_to_ptr.vmem [resolvable:$true] %s141_s1 }
   0x6   :  { %vm110_vm11 = vcmp.eq.s32.totalorder %v209_v4, 0 }
   0x7   :  { %v111_v63 = vsel %vm110_vm11, 1, %v184_v1 }
   0xc   :  { %31 = vperm.xlu0 %157, %v15_v2  }
  0x76   :  { %v29_v6 = vpop.permute.xlu0 %28 }
  0x77   :  { %vm33_vm1 = vcmp.eq.s32.totalorder %v209_v4, %v29_v6  ;;  %vm76_vm3 = vcmp.lt.s32.totalorder %v209_v4, %v29_v6 }
  0x78   :  { %v35_v7 = vsel %vm33_vm1, %v12_v5, -inf }
  0x79   :  { %v38_v8 = vsel %vm37_vm0, %v35_v7, -inf }
  0x7a   :  { %39 = vmax.xlane.f32.xlu1 %v38_v8 }
  0x7e   :  { %v32_v10 = vpop.permute.xlu0 %31 }
  0x7f   :  { %vm34_vm2 = vcmp.eq.s32.totalorder %v209_v4, %v32_v10  ;;  %vm77_vm7 = vcmp.lt.s32.totalorder %v209_v4, %v32_v10 }
  0x80   :  { %v36_v11 = vsel %vm34_vm2, %v13_v9, -inf }
  0x81   :  { %v41_v12 = vsel %vm37_vm0, %v36_v11, -inf }
  0x82   :  { %42 = vmax.xlane.f32.xlu1 %v41_v12 }
  0xed   :  { %v221_v13 = vpop.xlane.xlu1 %39 }
  0xee   :  { %vm74_vm4 = vcmp.eq.f32.partialorder %v12_v5, %v221_v13  ;;  %vm44_vm5 = vcmp.gt.f32.partialorder %v12_v5, %v221_v13  ;;  %vm114_vm12 = vcmp.gt.f32.partialorder %v221_v13, 0.0 }
  0xef   :  { %vm78_vm6 = vmand %vm74_vm4, %vm76_vm3  ;;  %v46_v14 = vsel %vm44_vm5, 1, %v184_v1  ;;  %vm134_vm3 = vcmask 0  }
  0xf0   :  { %v48_v15 = vsel %vm37_vm0, %v46_v14, 0  ;;  %v80_v16 = vsel %vm78_vm6, 1, %v184_v1 }
  0xf1   :  { %v50_v17 = vshrl.u32 %v48_v15, 16  ;;  %v82_v18 = vsel %vm37_vm0, %v80_v16, 0  ;;  %v49_v31 = vand.u32 65535, %v48_v15 }
  0xf2   :  { %v84_v19 = vshrl.u32 %v82_v18, 16  ;;  %v83_v35 = vand.u32 65535, %v82_v18 }
  0xf3   :  { %v52_v20 = vcvt.s32.f32 %v50_v17  ;;  %v51_v33 = vcvt.s32.f32 %v49_v31 }
  0xf4   :  { %v86_v21 = vcvt.s32.f32 %v84_v19  ;;  %v85_v37 = vcvt.s32.f32 %v83_v35 }
  0xf5   :  { %55 = vadd.xlane.f32.xlu2 %v52_v20  ;;  %v230_v22 = vpop.xlane.xlu1 %42 }
  0xf6   :  { %vm45_vm8 = vcmp.gt.f32.partialorder %v13_v9, %v230_v22  ;;  %vm75_vm9 = vcmp.eq.f32.partialorder %v13_v9, %v230_v22  ;;  %89 = vadd.xlane.f32.xlu0 %v86_v21 }
  0xf7   :  { %vm79_vm10 = vmand %vm75_vm9, %vm77_vm7  ;;  %v47_v23 = vsel %vm45_vm8, 1, %v184_v1 }
  0xf8   :  { %v61_v24 = vsel %vm37_vm0, %v47_v23, 0  ;;  %v81_v27 = vsel %vm79_vm10, 1, %v184_v1 }
  0xf9   :  { %v63_v25 = vshrl.u32 %v61_v24, 16  ;;  %v62_v26 = vand.u32 65535, %v61_v24  ;;  %v95_v30 = vsel %vm37_vm0, %v81_v27, 0  ;;  %vm115_vm0 = vcmp.gt.f32.partialorder %v230_v22, 0.0 }
  0xfa   :  { %v97_v32 = vshrl.u32 %v95_v30, 16  ;;  %v96_v36 = vand.u32 65535, %v95_v30 }
  0xfb   :  { %v65_v28 = vcvt.s32.f32 %v63_v25  ;;  %v64_v29 = vcvt.s32.f32 %v62_v26 }
  0xfc   :  { %v99_v34 = vcvt.s32.f32 %v97_v32  ;;  %v98_v38 = vcvt.s32.f32 %v96_v36 }
  0xfd   :  { %68 = vadd.xlane.f32.xlu2 %v65_v28  ;;  %66 = vadd.xlane.f32.xlu1 %v64_v29 }
 0x105   :  { %53 = vadd.xlane.f32.xlu2 %v51_v33  ;;  %102 = vadd.xlane.f32.xlu1 %v99_v34 }
 0x10d   :  { %87 = vadd.xlane.f32.xlu2 %v85_v37  ;;  %100 = vadd.xlane.f32.xlu1 %v98_v38 }
 0x168   :  { %v56_v39 = vpop.xlane.xlu2 %55 }
 0x169   :  { %v90_v44 = vpop.xlane.xlu0 %89  ;;  %v58_v46 = vcvt.f32.s32 %v56_v39 }
 0x16a   :  { %v92_v47 = vcvt.f32.s32 %v90_v44 }
 0x16b   :  { %v59_v51 = vshll.u32 %v58_v46, 16 }
 0x16c   :  { %v93_v52 = vshll.u32 %v92_v47, 16 }
 0x170   :  { %v69_v40 = vpop.xlane.xlu2 %68  ;;  %v67_v41 = vpop.xlane.xlu1 %66 }
 0x171   :  { %v71_v45 = vcvt.f32.s32 %v69_v40  ;;  %v70_v55 = vcvt.f32.s32 %v67_v41 }
 0x173   :  { %v72_v49 = vshll.u32 %v71_v45, 16 }
 0x175   :  { %v73_v59 = vadd.s32 %v72_v49, %v70_v55 }
 0x178   :  { %v54_v42 = vpop.xlane.xlu2 %53  ;;  %v103_v43 = vpop.xlane.xlu1 %102 }
 0x179   :  { %v105_v48 = vcvt.f32.s32 %v103_v43  ;;  %v57_v50 = vcvt.f32.s32 %v54_v42 }
 0x17b   :  { %v106_v56 = vshll.u32 %v105_v48, 16  ;;  %v60_v60 = vadd.s32 %v59_v51, %v57_v50 }
 0x180   :  { %v88_v53 = vpop.xlane.xlu2 %87  ;;  %v101_v54 = vpop.xlane.xlu1 %100 }
 0x181   :  { %v91_v57 = vcvt.f32.s32 %v88_v53  ;;  %v104_v58 = vcvt.f32.s32 %v101_v54 }
 0x183   :  { %v94_v61 = vadd.s32 %v93_v52, %v91_v57  ;;  %v107_v62 = vadd.s32 %v106_v56, %v104_v58 }
 0x185   :  { %v108_v0 = vadd.s32 %v94_v61, %v60_v60  ;;  %v109_v2 = vadd.s32 %v107_v62, %v73_v59 }
 0x187   :  { %vm112_vm14 = vcmp.lt.s32.totalorder %v108_v0, %v111_v63  ;;  %vm113_vm15 = vcmp.lt.s32.totalorder %v109_v2, %v111_v63 }
 0x188   :  { %vm116_vm1 = vmand %vm112_vm14, %vm114_vm12 }
 0x189   :  { %v152_v4 = vsel %vm116_vm1, 1.0, %v185_v3  ;;  %vm117_vm2 = vmand %vm113_vm15, %vm115_vm0 }
 0x18a   :  { %v125_v5 = vsel %vm124_vm13, %v152_v4, 0.0  ;;  %v153_v6 = vsel %vm117_vm2, 1.0, %v185_v3 }
 0x18b   :  { %v126_v7 = vsel %vm124_vm13, %v153_v6, 0.0 }
 0x18c   :  { %v127_v8 = vadd.f32 %v126_v7, %v125_v5 }
 0x18e   :  { %v128_v9 = vrot.slane %v127_v8, 4 }
 0x190   :  { %v129_v10 = vadd.f32 %v128_v9, %v127_v8 }
 0x192   :  { %v130_v1 = vrot.slane %v129_v10, 2 }
 0x194   :  { %v131_v11 = vadd.f32 %v130_v1, %v129_v10 }
 0x196   :  { %v132_v12 = vrot.slane %v131_v11, 1 }
 0x198   :  { %v133_v13 = vadd.f32 %v132_v12, %v131_v11 }
 0x19a   :  { %135 = vst.msk [vmem:[#allocation2] sm:$0x1] %vm134_vm3, %v133_v13 }
 0x19b   :  { %146 = dma.vmem_to_hbm [thread:$0]  %s142_s1, 16, %s144_s19, [#allocation3]  }
 0x19c   :  { %182 = dma.done.wait [#allocation3], 16  }
 0x19d   :  { %183 = vsyncadd [#allocation3], 4294967280 }
 0x19e   :  { %151 = vsyncpa [#allocation3], 1 }

</bundles_post_ra>
